<compile_context>
chip_gen: v5e
topology: v5e:2x2
jax: 0.10.0
libtpu: 0.0.40
codegen_flags: <defaults>
</compile_context>

<pallas_src>
import jax
import jax.numpy as jnp
from jax import lax
from jax.experimental import pallas as pl
from jax.experimental.pallas import tpu as pltpu


def _classifier_kernel(q_ref, cls_ref, src_ref, posk_ref, wkvt_ref, wo_ref,
                       out_ref, m_sc, l_sc, acc_sc):
    # q_ref    : (3, C)    bf16  scaled cls-token queries (cls @ Wq / sqrt(C)), grid-invariant
    # cls_ref  : (3, C)    f32   cls tokens (residual path), grid-invariant
    # src_ref  : (1, C, T) bf16  (image + dense prompt) tile, channel-major
    # posk_ref : (C, T)    bf16  (pos @ Wk)^T tile, grid-invariant over batch
    # wkvt_ref : (2C, C)   bf16  [Wk | Wv]^T -> one fused K/V projection matmul
    # wo_ref   : (C, C)    bf16
    # out_ref  : (1, 3, C) f32   cls-token outputs, written at the last hw tile
    # scratch  : m_sc (3,1) f32, l_sc (3,1) f32, acc_sc (3,C) f32 -- online-softmax state
    c = cls_ref.shape[1]
    h = pl.program_id(1)

    @pl.when(h == 0)
    def _():
        m_sc[...] = jnp.full(m_sc.shape, -jnp.inf, dtype=m_sc.dtype)
        l_sc[...] = jnp.zeros_like(l_sc)
        acc_sc[...] = jnp.zeros_like(acc_sc)

    src = src_ref[0]                                                       # [C, T] bf16
    # Fused K/V projection in channel-major layout: kvt[j, t] = sum_c wkv[c, j] * src[c, t].
    kvt = jnp.dot(wkvt_ref[...], src, preferred_element_type=jnp.float32)  # [2C, T] f32
    # Sublane-aligned split (C % 8 == 0 -> no lane relayout); (src+pos)@Wk = src@Wk + pos@Wk.
    kt = (kvt[:c, :] + posk_ref[...].astype(jnp.float32)).astype(jnp.bfloat16)  # [C, T]
    vt = kvt[c:, :].astype(jnp.bfloat16)                                        # [C, T]

    # scores[s, t] = sum_c q[s, c] * kt[c, t]
    scores = jnp.dot(q_ref[...], kt, preferred_element_type=jnp.float32)   # [3, T] f32

    # Online (flash-style) softmax update across hw tiles.
    m_prev = m_sc[...]
    m_new = jnp.maximum(m_prev, jnp.max(scores, axis=-1, keepdims=True))   # [3, 1]
    alpha = jnp.exp(m_prev - m_new)
    p = jnp.exp(scores - m_new)                                            # [3, T]
    l_sc[...] = alpha * l_sc[...] + jnp.sum(p, axis=-1, keepdims=True)
    acc_sc[...] = alpha * acc_sc[...] + lax.dot_general(
        p.astype(jnp.bfloat16), vt,
        dimension_numbers=(((1,), (1,)), ((), ())),                        # contract on T
        preferred_element_type=jnp.float32)                                # [3, C]
    m_sc[...] = m_new

    @pl.when(h == pl.num_programs(1) - 1)
    def _():
        ctx = acc_sc[...] / l_sc[...]                                      # exact normalization
        out_ref[0] = cls_ref[...] + jnp.dot(ctx.astype(jnp.bfloat16), wo_ref[...],
                                            preferred_element_type=jnp.float32)


def _pick_hw_tile(hw):
    # Single tile for small HW; otherwise 512-wide tiles (near the HBM-roofline sweet spot),
    # falling back to any 128-multiple divisor, else the full extent.
    if hw <= 512:
        return hw
    for t in (512, 256, 128):
        if hw % t == 0:
            return t
    return hw


def combined_classifier_batch_fore(params,
                                   image_embeddings,          # [B, C, H, W]
                                   image_pe,                  # [1, C, H, W]
                                   task_prompt_embeddings,    # [B, 3, C]   (unused by stub)
                                   sparse_prompt_embeddings,  # [B, Ns, C]  (unused by stub)
                                   dense_prompt_embeddings):  # [B, C, H, W]
    del task_prompt_embeddings, sparse_prompt_embeddings  # see TODO(synk) at top of file
    B, C, H, W = image_embeddings.shape
    HW = H * W
    t_hw = _pick_hw_tile(HW)
    n_hw = HW // t_hw

    # --- XLA glue (layout + grid-invariant hoists; no heavy compute) -------------------
    # Fused src = image + dense, cast to bf16, kept channel-major [B, C, HW]
    # (reshape is free; no NCHW transpose round-trip through HBM).
    src = (image_embeddings + dense_prompt_embeddings).reshape(B, C, HW).astype(jnp.bfloat16)
    pos = image_pe.reshape(1, C, HW)[0]                                        # [C, HW] f32

    # Grid-invariant hoists (computed once, reused for every batch / hw tile):
    pos_kt = jnp.dot(params["wk"].T, pos,
                     preferred_element_type=jnp.float32).astype(jnp.bfloat16)  # (pos @ Wk)^T
    cls_stack = jnp.concatenate([params["cls_token_bingli"][0],
                                 params["cls_token_fenhua"][0],
                                 params["cls_token_shendu"][0]], axis=0)       # [3, C] f32
    scale = 1.0 / jnp.sqrt(jnp.float32(C))
    q_scaled = (jnp.dot(cls_stack, params["wq"]) * scale).astype(jnp.bfloat16)      # [3, C]
    wkv_t = jnp.concatenate([params["wk"], params["wv"]], axis=1).T.astype(jnp.bfloat16)  # [2C, C]
    wo = params["wo"].astype(jnp.bfloat16)

    out = pl.pallas_call(
        _classifier_kernel,
        out_shape=jax.ShapeDtypeStruct((B, 3, C), jnp.float32),
        grid_spec=pltpu.PrefetchScalarGridSpec(
            num_scalar_prefetch=0,
            grid=(B, n_hw),                                          # hw (reduction) axis last
            in_specs=[
                pl.BlockSpec((3, C), lambda b, h: (0, 0)),           # q_scaled
                pl.BlockSpec((3, C), lambda b, h: (0, 0)),           # cls tokens (residual)
                pl.BlockSpec((1, C, t_hw), lambda b, h: (b, 0, h)),  # fused src tile
                pl.BlockSpec((C, t_hw), lambda b, h: (0, h)),        # (pos @ Wk)^T tile
                pl.BlockSpec((2 * C, C), lambda b, h: (0, 0)),       # [Wk | Wv]^T
                pl.BlockSpec((C, C), lambda b, h: (0, 0)),           # Wo
            ],
            out_specs=pl.BlockSpec((1, 3, C), lambda b, h: (b, 0, 0)),
            scratch_shapes=[
                pltpu.VMEM((3, 1), jnp.float32),     # running max
                pltpu.VMEM((3, 1), jnp.float32),     # running sum
                pltpu.VMEM((3, C), jnp.float32),     # running context accumulator
            ],
        ),
        # Batch axis parallel (megacore-shardable); hw is a carried reduction.
        # TODO(synk): on v7x with B == 1 in deployment, split the hw axis across the two
        # TensorCores (pltpu.CORE_PARALLEL / core_map) with a cross-core combine instead.
        compiler_params=pltpu.CompilerParams(
            dimension_semantics=("parallel", "arbitrary")),
    )(q_scaled, cls_stack, src, pos_kt, wkv_t, wo)

    # Mirrors PyTorch `cls_pred_x[:, 0, :].squeeze()` (drops the batch dim iff B == 1).
    cls_pred_bl = jnp.squeeze(out[:, 0, :])
    cls_pred_fh = jnp.squeeze(out[:, 1, :])
    cls_pred_sd = jnp.squeeze(out[:, 2, :])
    return cls_pred_bl, cls_pred_fh, cls_pred_sd


def init_params(key, transformer_dim):
    C = transformer_dim
    ks = jax.random.split(key, 7)

    # nn.init.trunc_normal_(std=0.02) equivalent (truncated at +/- 2 std).
    def tn(k, shape, std=0.02):
        return std * jax.random.truncated_normal(k, -2.0, 2.0, shape, jnp.float32)

    return {
        "cls_token_bingli": tn(ks[0], (1, 1, C)),
        "cls_token_fenhua": tn(ks[1], (1, 1, C)),
        "cls_token_shendu": tn(ks[2], (1, 1, C)),
        # synthetic transformer (single cross-attention layer) weights
        "wq": jax.random.normal(ks[3], (C, C), jnp.float32) / jnp.sqrt(C),
        "wk": jax.random.normal(ks[4], (C, C), jnp.float32) / jnp.sqrt(C),
        "wv": jax.random.normal(ks[5], (C, C), jnp.float32) / jnp.sqrt(C),
        "wo": jax.random.normal(ks[6], (C, C), jnp.float32) / jnp.sqrt(C),
    }


if __name__ == "__main__":
    B, C, H, W, Ns = 2, 32, 8, 8, 4  # batch, transformer_dim, spatial, sparse prompts
    key = jax.random.PRNGKey(0)
    k_par, k1, k2, k3, k4, k5 = jax.random.split(key, 6)

    params = init_params(k_par, C)
    image_embeddings = jax.random.normal(k1, (B, C, H, W), jnp.float32)
    image_pe = jax.random.normal(k2, (1, C, H, W), jnp.float32)
    task_prompt_embeddings = jax.random.normal(k3, (B, 3, C), jnp.float32)
    sparse_prompt_embeddings = jax.random.normal(k4, (B, Ns, C), jnp.float32)
    dense_prompt_embeddings = jax.random.normal(k5, (B, C, H, W), jnp.float32)

    fwd = jax.jit(combined_classifier_batch_fore)
    cls_bl, cls_fh, cls_sd = fwd(params, image_embeddings, image_pe,
                                 task_prompt_embeddings,
                                 sparse_prompt_embeddings,
                                 dense_prompt_embeddings)
    jax.block_until_ready((cls_bl, cls_fh, cls_sd))

    assert cls_bl.shape == (B, C) and cls_fh.shape == (B, C) and cls_sd.shape == (B, C)
    assert jnp.all(jnp.isfinite(cls_bl)) and jnp.all(jnp.isfinite(cls_fh)) \
        and jnp.all(jnp.isfinite(cls_sd))
    print("KERNEL_OK")
</pallas_src>

<mosaic_0001>
module attributes {stable_mosaic.version = 11 : i64} {
  func.func @_classifier_kernel(%arg0: i32, %arg1: i32, %arg2: memref<3x32xbf16, #tpu.memory_space<vmem>>, %arg3: memref<3x32xf32, #tpu.memory_space<vmem>>, %arg4: memref<1x32x64xbf16, #tpu.memory_space<vmem>>, %arg5: memref<32x64xbf16, #tpu.memory_space<vmem>>, %arg6: memref<64x32xbf16, #tpu.memory_space<vmem>>, %arg7: memref<32x32xbf16, #tpu.memory_space<vmem>>, %arg8: memref<1x3x32xf32, #tpu.memory_space<vmem>>, %arg9: memref<3x1xf32, #tpu.memory_space<vmem>>, %arg10: memref<3x1xf32, #tpu.memory_space<vmem>>, %arg11: memref<3x32xf32, #tpu.memory_space<vmem>>) attributes {dimension_semantics = [#tpu.dimension_semantics<parallel>, #tpu.dimension_semantics<arbitrary>], iteration_bounds = array<i64: 2, 1>, scalar_prefetch = 0 : i64, scratch_operands = 3 : i64, tpu.core_type = #tpu.core_type<tc>, window_params = [{pipeline_mode = #tpu.pipeline_mode<synchronous>, transform_indices = @transform_0, window_bounds = array<i64: 3, 32>}, {pipeline_mode = #tpu.pipeline_mode<synchronous>, transform_indices = @transform_1, window_bounds = array<i64: 3, 32>}, {transform_indices = @transform_2, window_bounds = array<i64: 1, 32, 64>}, {transform_indices = @transform_3, window_bounds = array<i64: 32, 64>}, {pipeline_mode = #tpu.pipeline_mode<synchronous>, transform_indices = @transform_4, window_bounds = array<i64: 64, 32>}, {pipeline_mode = #tpu.pipeline_mode<synchronous>, transform_indices = @transform_5, window_bounds = array<i64: 32, 32>}, {transform_indices = @transform_6, window_bounds = array<i64: 1, 3, 32>}]} {
    %c0_i32 = arith.constant 0 : i32
    %0 = arith.cmpi eq, %arg1, %c0_i32 : i32
    %1 = arith.extui %0 : i1 to i32
    %c0_i32_0 = arith.constant 0 : i32
    %2 = arith.cmpi ne, %1, %c0_i32_0 : i32
    scf.if %2 {
      %cst_27 = arith.constant 0xFF800000 : f32
      %42 = vector.broadcast %cst_27 : f32 to vector<3x1xf32>
      %c0_28 = arith.constant 0 : index
      %c0_29 = arith.constant 0 : index
      %43 = vector.load %arg9[%c0_28, %c0_29] : memref<3x1xf32, #tpu.memory_space<vmem>>, vector<3x1xf32>
      tpu.vector_store %arg9[%c0_28, %c0_29], %42 {strides = array<i32>} : memref<3x1xf32, #tpu.memory_space<vmem>>, vector<3x1xf32>,
      %cst_30 = arith.constant 0.000000e+00 : f32
      %44 = vector.broadcast %cst_30 : f32 to vector<3x1xf32>
      %c0_31 = arith.constant 0 : index
      %c0_32 = arith.constant 0 : index
      %45 = vector.load %arg10[%c0_31, %c0_32] : memref<3x1xf32, #tpu.memory_space<vmem>>, vector<3x1xf32>
      tpu.vector_store %arg10[%c0_31, %c0_32], %44 {strides = array<i32>} : memref<3x1xf32, #tpu.memory_space<vmem>>, vector<3x1xf32>,
      %cst_33 = arith.constant 0.000000e+00 : f32
      %46 = vector.broadcast %cst_33 : f32 to vector<3x32xf32>
      %c0_34 = arith.constant 0 : index
      %c0_35 = arith.constant 0 : index
      %47 = vector.load %arg11[%c0_34, %c0_35] : memref<3x32xf32, #tpu.memory_space<vmem>>, vector<3x32xf32>
      tpu.vector_store %arg11[%c0_34, %c0_35], %46 {strides = array<i32>} : memref<3x32xf32, #tpu.memory_space<vmem>>, vector<3x32xf32>,
    } else {
    }
    %c0 = arith.constant 0 : index
    %c0_1 = arith.constant 0 : index
    %c0_2 = arith.constant 0 : index
    %3 = vector.load %arg4[%c0, %c0_1, %c0_2] : memref<1x32x64xbf16, #tpu.memory_space<vmem>>, vector<1x32x64xbf16>
    %4 = vector.shape_cast %3 : vector<1x32x64xbf16> to vector<32x64xbf16>
    %c0_3 = arith.constant 0 : index
    %c0_4 = arith.constant 0 : index
    %5 = vector.load %arg6[%c0_3, %c0_4] : memref<64x32xbf16, #tpu.memory_space<vmem>>, vector<64x32xbf16>
    %cst = arith.constant dense<0.000000e+00> : vector<64x64xf32>
    %6 = tpu.matmul %5, %4, %cst {dimension_numbers = #tpu.dot_dimension_numbers<[1], [0], [0], [1], [0, 0, 1, 1], [], []>} : vector<64x32xbf16>, vector<32x64xbf16>, vector<64x64xf32> -> vector<64x64xf32>
    %7 = vector.extract_strided_slice %6 {offsets = [0, 0], sizes = [32, 64], strides = [1, 1]} : vector<64x64xf32> to vector<32x64xf32>
    %c0_5 = arith.constant 0 : index
    %c0_6 = arith.constant 0 : index
    %8 = vector.load %arg5[%c0_5, %c0_6] : memref<32x64xbf16, #tpu.memory_space<vmem>>, vector<32x64xbf16>
    %9 = arith.extf %8 : vector<32x64xbf16> to vector<32x64xf32>
    %10 = arith.addf %7, %9 : vector<32x64xf32>
    %11 = arith.truncf %10 : vector<32x64xf32> to vector<32x64xbf16>
    %12 = vector.extract_strided_slice %6 {offsets = [32, 0], sizes = [32, 64], strides = [1, 1]} : vector<64x64xf32> to vector<32x64xf32>
    %13 = arith.truncf %12 : vector<32x64xf32> to vector<32x64xbf16>
    %c0_7 = arith.constant 0 : index
    %c0_8 = arith.constant 0 : index
    %14 = vector.load %arg2[%c0_7, %c0_8] : memref<3x32xbf16, #tpu.memory_space<vmem>>, vector<3x32xbf16>
    %cst_9 = arith.constant dense<0.000000e+00> : vector<3x64xf32>
    %15 = tpu.matmul %14, %11, %cst_9 {dimension_numbers = #tpu.dot_dimension_numbers<[1], [0], [0], [1], [0, 0, 1, 1], [], []>} : vector<3x32xbf16>, vector<32x64xbf16>, vector<3x64xf32> -> vector<3x64xf32>
    %c0_10 = arith.constant 0 : index
    %c0_11 = arith.constant 0 : index
    %16 = vector.load %arg9[%c0_10, %c0_11] : memref<3x1xf32, #tpu.memory_space<vmem>>, vector<3x1xf32>
    %cst_12 = arith.constant dense<0xFF800000> : vector<3xf32>
    %17 = vector.multi_reduction <maximumf>, %15, %cst_12 [1] : vector<3x64xf32> to vector<3xf32>
    %18 = vector.shape_cast %17 : vector<3xf32> to vector<3x1xf32>
    %19 = arith.maximumf %16, %18 : vector<3x1xf32>
    %20 = arith.subf %16, %19 : vector<3x1xf32>
    %21 = math.exp %20 : vector<3x1xf32>
    %22 = vector.broadcast %19 : vector<3x1xf32> to vector<3x64xf32>
    %23 = arith.subf %15, %22 : vector<3x64xf32>
    %24 = math.exp %23 : vector<3x64xf32>
    %c0_13 = arith.constant 0 : index
    %c0_14 = arith.constant 0 : index
    %25 = vector.load %arg10[%c0_13, %c0_14] : memref<3x1xf32, #tpu.memory_space<vmem>>, vector<3x1xf32>
    %26 = arith.mulf %21, %25 : vector<3x1xf32>
    %cst_15 = arith.constant dense<0.000000e+00> : vector<3xf32>
    %27 = vector.multi_reduction <add>, %24, %cst_15 [1] : vector<3x64xf32> to vector<3xf32>
    %28 = vector.shape_cast %27 : vector<3xf32> to vector<3x1xf32>
    %29 = arith.addf %26, %28 : vector<3x1xf32>
    %c0_16 = arith.constant 0 : index
    %c0_17 = arith.constant 0 : index
    %30 = vector.load %arg10[%c0_16, %c0_17] : memref<3x1xf32, #tpu.memory_space<vmem>>, vector<3x1xf32>
    tpu.vector_store %arg10[%c0_16, %c0_17], %29 {strides = array<i32>} : memref<3x1xf32, #tpu.memory_space<vmem>>, vector<3x1xf32>,
    %c0_18 = arith.constant 0 : index
    %c0_19 = arith.constant 0 : index
    %31 = vector.load %arg11[%c0_18, %c0_19] : memref<3x32xf32, #tpu.memory_space<vmem>>, vector<3x32xf32>
    %32 = vector.broadcast %21 : vector<3x1xf32> to vector<3x32xf32>
    %33 = arith.mulf %32, %31 : vector<3x32xf32>
    %34 = arith.truncf %24 : vector<3x64xf32> to vector<3x64xbf16>
    %cst_20 = arith.constant dense<0.000000e+00> : vector<3x32xf32>
    %35 = tpu.matmul %34, %13, %cst_20 {dimension_numbers = #tpu.dot_dimension_numbers<[1], [1], [0], [0], [0, 0, 1, 0], [], []>} : vector<3x64xbf16>, vector<32x64xbf16>, vector<3x32xf32> -> vector<3x32xf32>
    %36 = arith.addf %33, %35 : vector<3x32xf32>
    %c0_21 = arith.constant 0 : index
    %c0_22 = arith.constant 0 : index
    %37 = vector.load %arg11[%c0_21, %c0_22] : memref<3x32xf32, #tpu.memory_space<vmem>>, vector<3x32xf32>
    tpu.vector_store %arg11[%c0_21, %c0_22], %36 {strides = array<i32>} : memref<3x32xf32, #tpu.memory_space<vmem>>, vector<3x32xf32>,
    %c0_23 = arith.constant 0 : index
    %c0_24 = arith.constant 0 : index
    %38 = vector.load %arg9[%c0_23, %c0_24] : memref<3x1xf32, #tpu.memory_space<vmem>>, vector<3x1xf32>
    tpu.vector_store %arg9[%c0_23, %c0_24], %19 {strides = array<i32>} : memref<3x1xf32, #tpu.memory_space<vmem>>, vector<3x1xf32>,
    %c0_i32_25 = arith.constant 0 : i32
    %39 = arith.cmpi eq, %arg1, %c0_i32_25 : i32
    %40 = arith.extui %39 : i1 to i32
    %c0_i32_26 = arith.constant 0 : i32
    %41 = arith.cmpi ne, %40, %c0_i32_26 : i32
    scf.if %41 {
      %c0_27 = arith.constant 0 : index
      %c0_28 = arith.constant 0 : index
      %42 = vector.load %arg11[%c0_27, %c0_28] : memref<3x32xf32, #tpu.memory_space<vmem>>, vector<3x32xf32>
      %c0_29 = arith.constant 0 : index
      %c0_30 = arith.constant 0 : index
      %43 = vector.load %arg10[%c0_29, %c0_30] : memref<3x1xf32, #tpu.memory_space<vmem>>, vector<3x1xf32>
      %44 = vector.broadcast %43 : vector<3x1xf32> to vector<3x32xf32>
      %45 = arith.divf %42, %44 : vector<3x32xf32>
      %c0_31 = arith.constant 0 : index
      %c0_32 = arith.constant 0 : index
      %46 = vector.load %arg3[%c0_31, %c0_32] : memref<3x32xf32, #tpu.memory_space<vmem>>, vector<3x32xf32>
      %47 = arith.truncf %45 : vector<3x32xf32> to vector<3x32xbf16>
      %c0_33 = arith.constant 0 : index
      %c0_34 = arith.constant 0 : index
      %48 = vector.load %arg7[%c0_33, %c0_34] : memref<32x32xbf16, #tpu.memory_space<vmem>>, vector<32x32xbf16>
      %cst_35 = arith.constant dense<0.000000e+00> : vector<3x32xf32>
      %49 = tpu.matmul %47, %48, %cst_35 {dimension_numbers = #tpu.dot_dimension_numbers<[1], [0], [0], [1], [0, 0, 1, 1], [], []>} : vector<3x32xbf16>, vector<32x32xbf16>, vector<3x32xf32> -> vector<3x32xf32>
      %50 = arith.addf %46, %49 : vector<3x32xf32>
      %c0_36 = arith.constant 0 : index
      %c0_37 = arith.constant 0 : index
      %c0_38 = arith.constant 0 : index
      %51 = vector.load %arg8[%c0_36, %c0_37, %c0_38] : memref<1x3x32xf32, #tpu.memory_space<vmem>>, vector<1x3x32xf32>
      %52 = vector.shape_cast %51 : vector<1x3x32xf32> to vector<3x32xf32>
      %53 = vector.shape_cast %50 : vector<3x32xf32> to vector<1x3x32xf32>
      tpu.vector_store %arg8[%c0_36, %c0_37, %c0_38], %53 {strides = array<i32>} : memref<1x3x32xf32, #tpu.memory_space<vmem>>, vector<1x3x32xf32>,
    } else {
    }
    return
  }
  func.func @transform_0(%arg0: i32, %arg1: i32) -> (i32, i32) {
    %c0_i32 = arith.constant 0 : i32
    %c0_i32_0 = arith.constant 0 : i32
    %c0_i32_1 = arith.constant 0 : i32
    return %c0_i32, %c0_i32_0 : i32, i32
  }
  func.func @transform_1(%arg0: i32, %arg1: i32) -> (i32, i32) {
    %c0_i32 = arith.constant 0 : i32
    %c0_i32_0 = arith.constant 0 : i32
    %c0_i32_1 = arith.constant 0 : i32
    return %c0_i32, %c0_i32_0 : i32, i32
  }
  func.func @transform_2(%arg0: i32, %arg1: i32) -> (i32, i32, i32) {
    %c0_i32 = arith.constant 0 : i32
    %c0_i32_0 = arith.constant 0 : i32
    return %arg0, %c0_i32, %arg1 : i32, i32, i32
  }
  func.func @transform_3(%arg0: i32, %arg1: i32) -> (i32, i32) {
    %c0_i32 = arith.constant 0 : i32
    %c0_i32_0 = arith.constant 0 : i32
    return %c0_i32, %arg1 : i32, i32
  }
  func.func @transform_4(%arg0: i32, %arg1: i32) -> (i32, i32) {
    %c0_i32 = arith.constant 0 : i32
    %c0_i32_0 = arith.constant 0 : i32
    %c0_i32_1 = arith.constant 0 : i32
    return %c0_i32, %c0_i32_0 : i32, i32
  }
  func.func @transform_5(%arg0: i32, %arg1: i32) -> (i32, i32) {
    %c0_i32 = arith.constant 0 : i32
    %c0_i32_0 = arith.constant 0 : i32
    %c0_i32_1 = arith.constant 0 : i32
    return %c0_i32, %c0_i32_0 : i32, i32
  }
  func.func @transform_6(%arg0: i32, %arg1: i32) -> (i32, i32, i32) {
    %c0_i32 = arith.constant 0 : i32
    %c0_i32_0 = arith.constant 0 : i32
    %c0_i32_1 = arith.constant 0 : i32
    return %arg0, %c0_i32, %c0_i32_0 : i32, i32, i32
  }
}

</mosaic_0001>

<bundles_post_ra>
// kernel: combined_classifier_batch_fore.1
= control target key start
LH: loop header
LB: loop body
LE: loop exit
PB: predicated region body
PF: predicated region fallthrough
CT: control target
= control target key end

     0   :  { %s793_s21 = smov 0   ;;  %s795_s22 = smov 0   ;;  %s878_s0 = inlined_call_operand.vmem [shape: bf16[3,32], index: 0, kind: input, shape index: {}]   ;;  %s879_s1 = inlined_call_operand.vmem [shape: f32[3,32], index: 1, kind: input, shape index: {}]   ;;  %s880_s2 = inlined_call_operand.vmem [shape: bf16[2,32,64], index: 2, kind: input, shape index: {}]   ;;  %s881_s3 = inlined_call_operand.vmem [shape: bf16[32,64], index: 3, kind: input, shape index: {}]   ;;  %s882_s4 = inlined_call_operand.vmem [shape: bf16[64,32], index: 4, kind: input, shape index: {}]   ;;  %s883_s5 = inlined_call_operand.vmem [shape: bf16[32,32], index: 5, kind: input, shape index: {}]   ;;  %s884_s6 = inlined_call_operand.vmem [shape: f32[2,3,32], index: 6, kind: output, shape index: {}]  }
   0x1   :  { %s797_s23 = smov 0  }
   0x2 LB: > { %s28_s24 = sadd.s32 1, %s749_s22  ;;  %p628_p0 = scmp.ge.s32.totalorder %s753_s23, 1  ;;  %s753_s23 = sphi %s797_s23, %s16_s23   ;;  %s749_s22 = sphi %s795_s22, %s886_s22   ;;  %s745_s21 = sphi %s793_s21, %s885_s21  }
   0x3   : > { %p30_p1 = scmp.ge.s32.totalorder %s28_s24, 2  ;;  %p238_p2 = scmp.lt.s32.totalorder %s753_s23, 3 }
   0x5   : > { %s888_s24 = smov (%p30_p1, %s28_s24), 0  ;;  %p239_p3 = pnand %p628_p0, %p238_p2 }
   0x6   : > { %p274_p4 = scmp.lt.s32.totalorder (!%p239_p3), %s745_s21, 1 }
   0x7   : > { %242 = sbr.rel (%p239_p3) target bundleno = 958 (0x3be), region = 44 }
   0xc   : > { %s890_s21 = smov (!%p274_p4, %s745_s21), 1  ;;  %v676_v2 = vld [vmem:[%s882_s4] sm:$0xff]  ;;  %vm344_vm0 = vcmask 261120   ;;  %v677_v3 = vld [vmem:[%s882_s4 + $0x8] sm:$0xff]  ;;  %v679_v4 = vld [vmem:[%s882_s4 + $0x18] sm:$0xff]  ;;  %vm452_vm1 = vcmask 523264  }
   0xd   : > { %s673_s25 = sshll.u32 %s890_s21, 4  ;;  %v678_v5 = vld [vmem:[%s882_s4 + $0x10] sm:$0xff]  ;;  %v690_v9 = vld [vmem:[%s881_s3 + $0x8] sm:$0xff]   ;;  %v683_v12 = vld [vmem:[%s881_s3] sm:$0xff]   ;;  %vm295_vm2 = vcmask 2048   ;;  %v755_v31 = vmov -inf  }
   0xe   : > { %s281_s28 = scalar_lea.vmem %s880_s2, %s673_s25  ;;  %v688_v10 = vunpack.c.l.bf16 %v690_v9  ;;  %v689_v11 = vunpack.c.h.bf16 %v690_v9  ;;  %v685_v13 = vunpack.c.h.bf16 %v683_v12  ;;  %v684_v15 = vunpack.c.l.bf16 %v683_v12  ;;  %v402_v22 = vld [vmem:[%s878_s0] sm:$0x3]  ;;  %296 = vst.msk [vmem:[#allocation2] sm:$0x7] %vm295_vm2, %v755_v31  ;;  %v681_v60 = vld [vmem:[%s883_s5 + $0x8] sm:$0xff]  ;;  %s631_s27 = sshll.u32 %s890_s21, 2 }
   0xf   : > { %v675_v0 = vld [vmem:[%s281_s28 + $0x8] sm:$0xff]  ;;  %v674_v1 = vld [vmem:[%s281_s28] sm:$0xff]  ;;  %vm420_vm3 = vcmask 518144   ;;  %v756_v35 = vmov 0   ;;  %v757_v36 = vmov 0.0   ;;  %vm298_vm4 = vcmask 256000   ;;  %s289_s8 = scalar_lea.vmem %s884_s6, %s631_s27 }
  0x10   : > { %363 = vmatpush.bf16.msra.mxu0 %v675_v0  ;;  %692 = vmatpush.bf16.msra.mxu3 %v675_v0  ;;  %297 = vst.msk [vmem:[#allocation3] sm:$0x7] %vm295_vm2, %v757_v36  ;;  %v680_v61 = vld [vmem:[%s883_s5] sm:$0xff] }
  0x11   : > { %691 = vmatpush.bf16.msra.mxu1 %v675_v0  ;;  %722 = vset.pattern.permute.xlu0 %v756_v35  ;;  %299 = vst.msk [vmem:[#allocation4] sm:$0x7] %vm298_vm4, %v757_v36  ;;  %v504_v12 = vld [vmem:[%s879_s1] sm:$0x7] }
  0x12   : > { %724 = vset.pattern.permute.xlu2 %v756_v35  ;;  %723 = vset.pattern.permute.xlu1 %v756_v35 }
  0x14   : > { %364 = vmatpush.bf16.msra.mxu0 %v674_v1  ;;  %694 = vmatpush.bf16.msra.mxu3 %v674_v1 }
  0x15   : > { %693 = vmatpush.bf16.msra.mxu1 %v674_v1  ;;  %v419_v37 = vld [vmem:[#allocation2] sm:$0x7] }
  0x17   : > { %656 = vmatmul.msk.bf16.vlgmr.msra.gmra.mxu0 %vm344_vm0, %v676_v2  ;;  %659 = vmatmul.msk.bf16.vlgmr.msra.gmra.mxu3 %vm344_vm0, %v679_v4  ;;  %v436_v49 = vld [vmem:[#allocation3] sm:$0x7] }
  0x18   : > { %658 = vmatmul.msk.bf16.vlgmr.msra.gmra.mxu1 %vm344_vm0, %v678_v5  ;;  %v444_v54 = vld [vmem:[#allocation4] sm:$0x7]  ;;  %531 = vmatpush.bf16.msrb.mxu3 %v681_v60 }
  0x1c   : > { %532 = vmatpush.bf16.msrb.mxu3 %v680_v61 }
  0x27   : > { %657 = vmatmul.msk.bf16.gmra.mxu0 %vm344_vm0, %v677_v3 }
  0x94   : > { %v366_v6 = vpop.f32.mrf.mxu0 }
  0x95   : > { %v394_v20 = vadd.f32 %v684_v15, %v366_v6  ;;  %v376_v24 = vpop.f32.mrf.mxu1 }
  0x9a   : > { %v381_v23 = vpop.f32.mrf.mxu3 }
  0x9c   : > { %v368_v7 = vpop.f32.mrf.mxu0 }
  0x9d   : > { %v395_v18 = vadd.f32 %v685_v13, %v368_v7  ;;  %v378_v28 = vpop.f32.mrf.mxu1 }
  0x9e   : > { %v400_v29 = vpack.c.bf16 %v378_v28, %v376_v24 }
  0x9f   : > { %v398_v21 = vpack.c.bf16 %v395_v18, %v394_v20 }
  0xa0   : > { %v457_v30 = vsel %vm452_vm1, %v400_v29, 0 }
  0xa2   : > { %v383_v25 = vpop.f32.mrf.mxu3 }
  0xa3   : > { %v401_v26 = vpack.c.bf16 %v383_v25, %v381_v23 }
  0xa4   : > { %v371_v8 = vpop.f32.mrf.mxu0 }
  0xa5   : > { %v396_v16 = vadd.f32 %v688_v10, %v371_v8  ;;  %v460_v27 = vsel %vm452_vm1, %v401_v26, 0 }
  0xa6   : > { %468 = vmatpush.bf16.xpose.msra.mxu2 %v460_v27 }
  0xac   : > { %v373_v14 = vpop.f32.mrf.mxu0 }
  0xad   : > { %v397_v17 = vadd.f32 %v689_v11, %v373_v14 }
  0xae   : > { %469 = vmatpush.bf16.xpose.msra.mxu2 %v457_v30 }
  0xaf   : > { %v399_v19 = vpack.c.bf16 %v397_v17, %v396_v16 }
  0xb1   : > { %412 = vmatpush.bf16.msrb.mxu1 %v399_v19 }
  0xb5   : > { %413 = vmatpush.bf16.msrb.mxu1 %v398_v21 }
  0xb8   : > { %660 = vmatmul.msk.bf16.vlgmr.msrb.gmra.mxu1 %vm344_vm0, %v402_v22 }
 0x135   : > { %v415_v32 = vpop.f32.mrf.mxu1 }
 0x136   : > { %v421_v33 = vsel %vm420_vm3, %v415_v32, -inf }
 0x137   : > { %422 = vmax.xlane.f32.xlu0 %v421_v33 }
 0x13d   : > { %v417_v34 = vpop.f32.mrf.mxu1 }
 0x1aa   : > { %v423_v38 = vpop.xlane.xlu0 %422 }
 0x1ab   : > { %v424_v39 = vmax.f32 %v419_v37, %v423_v38 }
 0x1ad   : > { %v425_v40 = vsub.f32 %v419_v37, %v424_v39  ;;  %478 = vst.msk [vmem:[#allocation2] sm:$0x7] %vm295_vm2, %v424_v39  ;;  %430 = vperm.xlu0 %722, %v424_v39  }
 0x1af   : > { %v426_v41 = vmul.f32 1.442695, %v425_v40 }
 0x1b1   : > { %725 = vpow2.f32 %v426_v41 }
 0x1b7   : > { %v726_v42 = vpop.eup %725 }
 0x1b8   : > { %447 = vperm.xlu2 %724, %v726_v42   ;;  %v437_v50 = vmul.f32 %v726_v42, %v436_v49 }
 0x212   : > { %v448_v55 = vpop.permute.xlu2 %447 }
 0x213   : > { %v450_v56 = vmul.f32 %v448_v55, %v444_v54 }
 0x21f   : > { %v431_v43 = vpop.permute.xlu0 %430 }
 0x220   : > { %v433_v44 = vsub.f32 %v415_v32, %v431_v43 }
 0x222   : > { %v434_v45 = vmul.f32 1.442695, %v433_v44 }
 0x224   : > { %727 = vpow2.f32 %v434_v45 }
 0x22a   : > { %v728_v46 = vpop.eup %727 }
 0x22b   : > { %v438_v47 = vsel %vm420_vm3, %v728_v46, 0.0  ;;  %v451_v48 = vpack.c.bf16 %v728_v46, %v728_v46 }
 0x22c   : > { %439 = vadd.xlane.f32.xlu1 %v438_v47 }
 0x22d   : > { %661 = vmatmul.msk.bf16.vlgmr.msra.gmra.mxu2 %vm452_vm1, %v451_v48 }
 0x29f   : > { %v440_v51 = vpop.xlane.xlu1 %439 }
 0x2a0   : > { %v441_v52 = vadd.f32 %v440_v51, %v437_v50 }
 0x2a2   : > { %443 = vst.msk [vmem:[#allocation3] sm:$0x7] %vm295_vm2, %v441_v52 }
 0x2a9   : > { %v483_v53 = vld [vmem:[#allocation3] sm:$0x7] }
 0x2aa   : > { %486 = vperm.xlu1 %723, %v483_v53  }
 0x2b0   : > { %v471_v57 = vpop.f32.mrf.mxu2 }
 0x2b1   : > { %v475_v58 = vadd.f32 %v471_v57, %v450_v56 }
 0x2b3   : > { %477 = vst.msk [vmem:[#allocation4] sm:$0x7] %vm298_vm4, %v475_v58 }
 0x2b8   : > { %v473_v59 = vpop.f32.mrf.mxu2 }
 0x2ba   : > { %v482_v9 = vld [vmem:[#allocation4] sm:$0x7] }
 0x31c   : > { %v487_v62 = vpop.permute.xlu1 %486 }
 0x31d   : > { %729 = vrcp.f32 %v487_v62  ;;  %v500_v2 = vand.u32 2147483648, %v487_v62  ;;  %v498_v4 = vand.u32 2147483647, %v487_v62  ;;  %vm494_vm6 = vweird.f32 %v487_v62 }
 0x31f   : > { %v501_v6 = vor.u32 1.1754944e-38, %v500_v2  ;;  %vm499_vm8 = vcmp.eq.f32.partialorder %v498_v4, 8.507059e+37 }
 0x323   : > { %v730_v63 = vpop.eup %729 }
 0x324   : > { %v490_v0 = vmul.f32 %v730_v63, %v487_v62  ;;  %vm495_vm5 = vweird.f32 %v730_v63 }
 0x325   : > { %vm496_vm7 = vmor %vm494_vm6, %vm495_vm5 }
 0x326   : > { %v491_v1 = vsub.f32 1.0, %v490_v0 }
 0x328   : > { %v492_v3 = vmul.f32 %v730_v63, %v491_v1 }
 0x32a   : > { %v493_v5 = vadd.f32 %v730_v63, %v492_v3 }
 0x32c   : > { %v497_v7 = vsel %vm496_vm7, %v730_v63, %v493_v5 }
 0x32d   : > { %v502_v8 = vsel %vm499_vm8, %v501_v6, %v497_v7 }
 0x32e   : > { %v503_v10 = vmul.f32 %v502_v8, %v482_v9 }
 0x330   : > { %v505_v11 = vpack.c.bf16 %v503_v10, %v503_v10 }
 0x332   : > { %670 = vmatmul.msk.bf16.vlgmr.msrb.gmra.mxu3 %vm344_vm0, %v505_v11 }
 0x3b5   : > { %v534_v13 = vpop.f32.mrf.mxu3 }
 0x3b6   : > { %v538_v14 = vadd.f32 %v534_v13, %v504_v12 }
 0x3b8   : > { %539 = vst.msk [vmem:[%s289_s8] sm:$0x7] %vm298_vm4, %v538_v14 }
 0x3bd   : > { %v536_v15 = vpop.f32.mrf.mxu3 }
 0x3be PF: > { %s16_s23 = sadd.s32 1, %s753_s23   ;;  %s885_s21 = smov %s749_s22 }
 0x3bf   : > { %p13_p5 = scmp.ge.s32.totalorder %s16_s23, 4   ;;  %s886_s22 = smov %s888_s24 }
 0x3c1   :  { %15 = sbr.rel (!%p13_p5) target bundleno = 2 (0x2), region = 85 }

</bundles_post_ra>
